<compile_context>
chip_gen: v7x
topology: tpu7x:2x2x1
jax: 0.10.0
libtpu: 0.0.40
codegen_flags: <defaults>
</compile_context>

<pallas_src>
import jax
import jax.numpy as jnp
from jax.experimental import pallas as pl
from jax.experimental.pallas import tpu as pltpu

IN_FEATURES = 8
HIDDEN_FEATURES = 128
OUT_FEATURES = 1

DEFAULT_TILE_M = 512  # rows of x processed per grid step


def _round_up(n, m):
    return ((n + m - 1) // m) * m


def mlp_kernel(x_ref, w1_ref, b1_ref, w2_ref, b2_ref, w3_ref, b3_ref,
               w4_ref, b4_ref, o_ref):
    # Activations stream per-tile; weights are VMEM-resident across the grid.
    x = x_ref[...].astype(jnp.bfloat16)

    h1 = jnp.dot(x, w1_ref[...], preferred_element_type=jnp.float32) + b1_ref[...]
    h1 = jnp.maximum(h1, 0.0)

    h2 = jnp.dot(h1.astype(jnp.bfloat16), w2_ref[...],
                 preferred_element_type=jnp.float32) + b2_ref[...]
    h2 = jnp.maximum(h2, 0.0)

    h3 = jnp.dot(h2.astype(jnp.bfloat16), w3_ref[...],
                 preferred_element_type=jnp.float32) + b3_ref[...]
    h3 = jnp.maximum(h3, 0.0)

    # Final 128 -> 1 layer on the VPU/XLU: broadcast-multiply by the single
    # weight row and reduce over lanes (avoids an N=1 MXU matmul).
    w4_row = w4_ref[...].astype(jnp.float32)                    # (1, 128)
    out = jnp.sum(h3 * w4_row, axis=-1, keepdims=True) + b4_ref[...]
    o_ref[...] = out.astype(o_ref.dtype)


def mlp_forward(x, params, tile_m=DEFAULT_TILE_M):
    w1, b1, w2, b2, w3, b3, w4, b4 = params
    batch = x.shape[0]

    # Keep tiles sublane-aligned (multiple of 8) and no bigger than needed.
    tile_m = min(tile_m, _round_up(batch, 8))
    num_tiles = pl.cdiv(batch, tile_m)
    padded = num_tiles * tile_m
    if padded != batch:
        x = jnp.pad(x, ((0, padded - batch), (0, 0)))

    def resident(arr):
        # Full array, same block index at every grid step -> stays in VMEM.
        return pl.BlockSpec(arr.shape, lambda i: (0,) * arr.ndim)

    out = pl.pallas_call(
        mlp_kernel,
        out_shape=jax.ShapeDtypeStruct((padded, OUT_FEATURES), jnp.float32),
        grid=(num_tiles,),
        in_specs=[pl.BlockSpec((tile_m, IN_FEATURES), lambda i: (i, 0)),
                  resident(w1), resident(b1), resident(w2), resident(b2),
                  resident(w3), resident(b3), resident(w4), resident(b4)],
        out_specs=pl.BlockSpec((tile_m, OUT_FEATURES), lambda i: (i, 0)),
        compiler_params=pltpu.CompilerParams(
            dimension_semantics=("parallel",)),
    )(x, w1, b1, w2, b2, w3, b3, w4, b4)
    return out[:batch]


def init_params(key):
    """Deterministic init mirroring nn.Linear. fc1..fc3 stored as (in, out) bf16;
    fc4 stored as its single row (1, in) bf16 so the last layer is mul+reduce."""
    keys = jax.random.split(key, 8)

    def linear_init(kw, kb, fan_in, fan_out, w_shape):
        bound = 1.0 / float(fan_in) ** 0.5   # PyTorch default: U(-1/sqrt(in), 1/sqrt(in))
        w = jax.random.uniform(kw, w_shape, jnp.float32, -bound, bound)
        b = jax.random.uniform(kb, (1, fan_out), jnp.float32, -bound, bound)
        return w.astype(jnp.bfloat16), b

    w1, b1 = linear_init(keys[0], keys[1], IN_FEATURES, HIDDEN_FEATURES,
                         (IN_FEATURES, HIDDEN_FEATURES))
    w2, b2 = linear_init(keys[2], keys[3], HIDDEN_FEATURES, HIDDEN_FEATURES,
                         (HIDDEN_FEATURES, HIDDEN_FEATURES))
    w3, b3 = linear_init(keys[4], keys[5], HIDDEN_FEATURES, HIDDEN_FEATURES,
                         (HIDDEN_FEATURES, HIDDEN_FEATURES))
    w4, b4 = linear_init(keys[6], keys[7], HIDDEN_FEATURES, OUT_FEATURES,
                         (OUT_FEATURES, HIDDEN_FEATURES))
    return (w1, b1, w2, b2, w3, b3, w4, b4)


def reference_forward(x, params):
    """Pure-JAX reference following the same bf16-operand / f32-accumulate path."""
    w1, b1, w2, b2, w3, b3, w4, b4 = params
    f32 = jnp.float32
    h1 = jnp.maximum(jnp.dot(x.astype(jnp.bfloat16), w1,
                             preferred_element_type=f32) + b1, 0.0)
    h2 = jnp.maximum(jnp.dot(h1.astype(jnp.bfloat16), w2,
                             preferred_element_type=f32) + b2, 0.0)
    h3 = jnp.maximum(jnp.dot(h2.astype(jnp.bfloat16), w3,
                             preferred_element_type=f32) + b3, 0.0)
    return jnp.sum(h3 * w4.astype(f32), axis=-1, keepdims=True) + b4


if __name__ == "__main__":
    key = jax.random.PRNGKey(0)
    kx, kp = jax.random.split(key)
    params = init_params(kp)

    # Small primary check.
    batch = 8
    x = jax.random.normal(kx, (batch, IN_FEATURES), dtype=jnp.float32)
    out = jax.block_until_ready(mlp_forward(x, params))
    ref = reference_forward(x, params)
    assert out.shape == (batch, OUT_FEATURES)
    assert jnp.allclose(out, ref, atol=1e-3, rtol=1e-3), "mismatch vs reference (batch=8)"

    # Exercise the batch grid + padding path (non-multiple of TILE_M, 2 grid steps).
    batch2 = 1000
    x2 = jax.random.normal(jax.random.PRNGKey(1), (batch2, IN_FEATURES), dtype=jnp.float32)
    out2 = jax.block_until_ready(mlp_forward(x2, params))
    ref2 = reference_forward(x2, params)
    assert out2.shape == (batch2, OUT_FEATURES)
    assert jnp.allclose(out2, ref2, atol=1e-3, rtol=1e-3), "mismatch vs reference (batch=1000)"

    print("KERNEL_OK")
</pallas_src>

<mosaic_0001>
module attributes {stable_mosaic.version = 11 : i64} {
  func.func @mlp_kernel(%arg0: i32, %arg1: memref<8x8xf32, #tpu.memory_space<vmem>>, %arg2: memref<8x128xbf16, #tpu.memory_space<vmem>>, %arg3: memref<1x128xf32, #tpu.memory_space<vmem>>, %arg4: memref<128x128xbf16, #tpu.memory_space<vmem>>, %arg5: memref<1x128xf32, #tpu.memory_space<vmem>>, %arg6: memref<128x128xbf16, #tpu.memory_space<vmem>>, %arg7: memref<1x128xf32, #tpu.memory_space<vmem>>, %arg8: memref<1x128xbf16, #tpu.memory_space<vmem>>, %arg9: memref<1x1xf32, #tpu.memory_space<vmem>>, %arg10: memref<8x1xf32, #tpu.memory_space<vmem>>) attributes {dimension_semantics = [#tpu.dimension_semantics<parallel>], iteration_bounds = array<i64: 1>, scalar_prefetch = 0 : i64, scratch_operands = 0 : i64, tpu.core_type = #tpu.core_type<tc>, window_params = [{transform_indices = @transform_0, window_bounds = array<i64: 8, 8>}, {pipeline_mode = #tpu.pipeline_mode<synchronous>, transform_indices = @transform_1, window_bounds = array<i64: 8, 128>}, {pipeline_mode = #tpu.pipeline_mode<synchronous>, transform_indices = @transform_2, window_bounds = array<i64: 1, 128>}, {pipeline_mode = #tpu.pipeline_mode<synchronous>, transform_indices = @transform_3, window_bounds = array<i64: 128, 128>}, {pipeline_mode = #tpu.pipeline_mode<synchronous>, transform_indices = @transform_4, window_bounds = array<i64: 1, 128>}, {pipeline_mode = #tpu.pipeline_mode<synchronous>, transform_indices = @transform_5, window_bounds = array<i64: 128, 128>}, {pipeline_mode = #tpu.pipeline_mode<synchronous>, transform_indices = @transform_6, window_bounds = array<i64: 1, 128>}, {pipeline_mode = #tpu.pipeline_mode<synchronous>, transform_indices = @transform_7, window_bounds = array<i64: 1, 128>}, {pipeline_mode = #tpu.pipeline_mode<synchronous>, transform_indices = @transform_8, window_bounds = array<i64: 1, 1>}, {transform_indices = @transform_9, window_bounds = array<i64: 8, 1>}]} {
    %c0 = arith.constant 0 : index
    %c0_0 = arith.constant 0 : index
    %0 = vector.load %arg1[%c0, %c0_0] : memref<8x8xf32, #tpu.memory_space<vmem>>, vector<8x8xf32>
    %1 = arith.truncf %0 : vector<8x8xf32> to vector<8x8xbf16>
    %c0_1 = arith.constant 0 : index
    %c0_2 = arith.constant 0 : index
    %2 = vector.load %arg2[%c0_1, %c0_2] : memref<8x128xbf16, #tpu.memory_space<vmem>>, vector<8x128xbf16>
    %cst = arith.constant dense<0.000000e+00> : vector<8x128xf32>
    %3 = tpu.matmul %1, %2, %cst {dimension_numbers = #tpu.dot_dimension_numbers<[1], [0], [0], [1], [0, 0, 1, 1], [], []>} : vector<8x8xbf16>, vector<8x128xbf16>, vector<8x128xf32> -> vector<8x128xf32>
    %c0_3 = arith.constant 0 : index
    %c0_4 = arith.constant 0 : index
    %4 = vector.load %arg3[%c0_3, %c0_4] : memref<1x128xf32, #tpu.memory_space<vmem>>, vector<1x128xf32>
    %5 = vector.broadcast %4 : vector<1x128xf32> to vector<8x128xf32>
    %6 = arith.addf %3, %5 : vector<8x128xf32>
    %cst_5 = arith.constant 0.000000e+00 : f32
    %7 = vector.broadcast %cst_5 : f32 to vector<8x128xf32>
    %8 = arith.maximumf %6, %7 : vector<8x128xf32>
    %9 = arith.truncf %8 : vector<8x128xf32> to vector<8x128xbf16>
    %c0_6 = arith.constant 0 : index
    %c0_7 = arith.constant 0 : index
    %10 = vector.load %arg4[%c0_6, %c0_7] : memref<128x128xbf16, #tpu.memory_space<vmem>>, vector<128x128xbf16>
    %cst_8 = arith.constant dense<0.000000e+00> : vector<8x128xf32>
    %11 = tpu.matmul %9, %10, %cst_8 {dimension_numbers = #tpu.dot_dimension_numbers<[1], [0], [0], [1], [0, 0, 1, 1], [], []>} : vector<8x128xbf16>, vector<128x128xbf16>, vector<8x128xf32> -> vector<8x128xf32>
    %c0_9 = arith.constant 0 : index
    %c0_10 = arith.constant 0 : index
    %12 = vector.load %arg5[%c0_9, %c0_10] : memref<1x128xf32, #tpu.memory_space<vmem>>, vector<1x128xf32>
    %13 = vector.broadcast %12 : vector<1x128xf32> to vector<8x128xf32>
    %14 = arith.addf %11, %13 : vector<8x128xf32>
    %cst_11 = arith.constant 0.000000e+00 : f32
    %15 = vector.broadcast %cst_11 : f32 to vector<8x128xf32>
    %16 = arith.maximumf %14, %15 : vector<8x128xf32>
    %17 = arith.truncf %16 : vector<8x128xf32> to vector<8x128xbf16>
    %c0_12 = arith.constant 0 : index
    %c0_13 = arith.constant 0 : index
    %18 = vector.load %arg6[%c0_12, %c0_13] : memref<128x128xbf16, #tpu.memory_space<vmem>>, vector<128x128xbf16>
    %cst_14 = arith.constant dense<0.000000e+00> : vector<8x128xf32>
    %19 = tpu.matmul %17, %18, %cst_14 {dimension_numbers = #tpu.dot_dimension_numbers<[1], [0], [0], [1], [0, 0, 1, 1], [], []>} : vector<8x128xbf16>, vector<128x128xbf16>, vector<8x128xf32> -> vector<8x128xf32>
    %c0_15 = arith.constant 0 : index
    %c0_16 = arith.constant 0 : index
    %20 = vector.load %arg7[%c0_15, %c0_16] : memref<1x128xf32, #tpu.memory_space<vmem>>, vector<1x128xf32>
    %21 = vector.broadcast %20 : vector<1x128xf32> to vector<8x128xf32>
    %22 = arith.addf %19, %21 : vector<8x128xf32>
    %cst_17 = arith.constant 0.000000e+00 : f32
    %23 = vector.broadcast %cst_17 : f32 to vector<8x128xf32>
    %24 = arith.maximumf %22, %23 : vector<8x128xf32>
    %c0_18 = arith.constant 0 : index
    %c0_19 = arith.constant 0 : index
    %25 = vector.load %arg8[%c0_18, %c0_19] : memref<1x128xbf16, #tpu.memory_space<vmem>>, vector<1x128xbf16>
    %26 = arith.extf %25 : vector<1x128xbf16> to vector<1x128xf32>
    %27 = vector.broadcast %26 : vector<1x128xf32> to vector<8x128xf32>
    %28 = arith.mulf %24, %27 : vector<8x128xf32>
    %cst_20 = arith.constant dense<0.000000e+00> : vector<8xf32>
    %29 = vector.multi_reduction <add>, %28, %cst_20 [1] : vector<8x128xf32> to vector<8xf32>
    %30 = vector.shape_cast %29 : vector<8xf32> to vector<8x1xf32>
    %c0_21 = arith.constant 0 : index
    %c0_22 = arith.constant 0 : index
    %31 = vector.load %arg9[%c0_21, %c0_22] : memref<1x1xf32, #tpu.memory_space<vmem>>, vector<1x1xf32>
    %32 = vector.broadcast %31 : vector<1x1xf32> to vector<8x1xf32>
    %33 = arith.addf %30, %32 : vector<8x1xf32>
    %c0_23 = arith.constant 0 : index
    %c0_24 = arith.constant 0 : index
    %34 = vector.load %arg10[%c0_23, %c0_24] : memref<8x1xf32, #tpu.memory_space<vmem>>, vector<8x1xf32>
    tpu.vector_store %arg10[%c0_23, %c0_24], %33 {strides = array<i32>} : memref<8x1xf32, #tpu.memory_space<vmem>>, vector<8x1xf32>,
    return
  }
  func.func @transform_0(%arg0: i32) -> (i32, i32) {
    %c0_i32 = arith.constant 0 : i32
    %c0_i32_0 = arith.constant 0 : i32
    return %arg0, %c0_i32 : i32, i32
  }
  func.func @transform_1(%arg0: i32) -> (i32, i32) {
    %c0_i32 = arith.constant 0 : i32
    %c0_i32_0 = arith.constant 0 : i32
    %c0_i32_1 = arith.constant 0 : i32
    return %c0_i32, %c0_i32_0 : i32, i32
  }
  func.func @transform_2(%arg0: i32) -> (i32, i32) {
    %c0_i32 = arith.constant 0 : i32
    %c0_i32_0 = arith.constant 0 : i32
    %c0_i32_1 = arith.constant 0 : i32
    return %c0_i32, %c0_i32_0 : i32, i32
  }
  func.func @transform_3(%arg0: i32) -> (i32, i32) {
    %c0_i32 = arith.constant 0 : i32
    %c0_i32_0 = arith.constant 0 : i32
    %c0_i32_1 = arith.constant 0 : i32
    return %c0_i32, %c0_i32_0 : i32, i32
  }
  func.func @transform_4(%arg0: i32) -> (i32, i32) {
    %c0_i32 = arith.constant 0 : i32
    %c0_i32_0 = arith.constant 0 : i32
    %c0_i32_1 = arith.constant 0 : i32
    return %c0_i32, %c0_i32_0 : i32, i32
  }
  func.func @transform_5(%arg0: i32) -> (i32, i32) {
    %c0_i32 = arith.constant 0 : i32
    %c0_i32_0 = arith.constant 0 : i32
    %c0_i32_1 = arith.constant 0 : i32
    return %c0_i32, %c0_i32_0 : i32, i32
  }
  func.func @transform_6(%arg0: i32) -> (i32, i32) {
    %c0_i32 = arith.constant 0 : i32
    %c0_i32_0 = arith.constant 0 : i32
    %c0_i32_1 = arith.constant 0 : i32
    return %c0_i32, %c0_i32_0 : i32, i32
  }
  func.func @transform_7(%arg0: i32) -> (i32, i32) {
    %c0_i32 = arith.constant 0 : i32
    %c0_i32_0 = arith.constant 0 : i32
    %c0_i32_1 = arith.constant 0 : i32
    return %c0_i32, %c0_i32_0 : i32, i32
  }
  func.func @transform_8(%arg0: i32) -> (i32, i32) {
    %c0_i32 = arith.constant 0 : i32
    %c0_i32_0 = arith.constant 0 : i32
    %c0_i32_1 = arith.constant 0 : i32
    return %c0_i32, %c0_i32_0 : i32, i32
  }
  func.func @transform_9(%arg0: i32) -> (i32, i32) {
    %c0_i32 = arith.constant 0 : i32
    %c0_i32_0 = arith.constant 0 : i32
    return %arg0, %c0_i32 : i32, i32
  }
}

</mosaic_0001>

<bundles_post_ra>
// kernel: tpu_custom_call.1
= control target key start
LH: loop header
LB: loop body
LE: loop exit
PB: predicated region body
PF: predicated region fallthrough
CT: control target
= control target key end

     0   :  { %s707_s0 = inlined_call_operand.hbm [shape: f32[8,8], index: 0, kind: input, shape index: {}]   ;;  %s708_s1 = inlined_call_operand.vmem [shape: bf16[8,128], index: 1, kind: input, shape index: {}]   ;;  %s709_s2 = inlined_call_operand.vmem [shape: f32[1,128], index: 2, kind: input, shape index: {}]   ;;  %s710_s3 = inlined_call_operand.hbm [shape: bf16[128,128], index: 3, kind: input, shape index: {}]   ;;  %s711_s4 = inlined_call_operand.vmem [shape: f32[1,128], index: 4, kind: input, shape index: {}]   ;;  %s712_s5 = inlined_call_operand.hbm [shape: bf16[128,128], index: 5, kind: input, shape index: {}]   ;;  %s713_s6 = inlined_call_operand.vmem [shape: f32[1,128], index: 6, kind: input, shape index: {}]   ;;  %s714_s7 = inlined_call_operand.vmem [shape: bf16[1,128], index: 7, kind: input, shape index: {}]   ;;  %s715_s8 = inlined_call_operand.<no memory space> [shape: f32[1,1], index: 8, kind: input, shape index: {}]   ;;  %s716_s9 = inlined_call_operand.vmem [shape: f32[8,1], index: 9, kind: output, shape index: {}]  }
   0x1   :  { %v14_v0 = vstv %s715_s8 }
   0x2   :  { %15 = vst [vmem:[#allocation2] sm:$0x1] %v14_v0 }
   0x3   :  { %16 = vsyncpa [#allocation4], 0 }
   0x4   :  { %17 = vsyncpa [#allocation6], 0  ;;  %s564_s11 = smov [#allocation5]   ;;  %s494_s15 = scalar_lea.hbm %s710_s3, 1024 }
   0x5   :  { %s37_s12 = sshll.u32 %s564_s11, 4  ;;  %p495_p0 = scmp.ne.s32.totalorder %s710_s3, %s494_s15  ;;  %s38_s12 = int_to_ptr.vmem [resolvable:$true] %s37_s12 }
   0x6   :  { %p498_p1 = scmp.lt.u32.totalorder %s494_s15, %s710_s3 }
   0x8   :  { %p500_p2 = pnand %p498_p1, %p495_p0 }
   0xa   :  { %503 = shalt.err (!%p500_p2)
}
   0xb   :  { %s504_s8 = scalar_lea.vmem %s38_s12, 1024  ;;  %p509_p4 = scmp.lt.s32.totalorder %s38_s12, %s38_s12 }
   0xc   :  { %p505_p3 = scmp.ne.s32.totalorder %s38_s12, %s504_s8  ;;  %p510_p5 = scmp.lt.s32.totalorder %s504_s8, %s504_s8 }
   0xe   :  { %p511_p6 = por %p510_p5, %p509_p4 }
  0x10   :  { %p512_p7 = pnand %p511_p6, %p505_p3 }
  0x12   :  { %515 = shalt.err (!%p512_p7)
}
  0x13   :  { %s565_s20 = smov 64   ;;  %s566_s21 = smov 4  }
  0x14   :  { %43 = dma.hbm_to_vmem [thread:$0]  %s710_s3, 1024, %s38_s12, [#allocation6], %s565_s20, %s565_s20, %s566_s21  }
  0x15   :  { %s567_s24 = smov [#allocation3]   ;;  %s568_s26 = smov [#allocation7]  }
  0x16   :  { %s24_s25 = sshll.u32 %s567_s24, 4  ;;  %s51_s27 = sshll.u32 %s568_s26, 4  ;;  %s25_s25 = int_to_ptr.vmem [resolvable:$true] %s24_s25  ;;  %s52_s27 = int_to_ptr.vmem [resolvable:$true] %s51_s27 }
  0x17   :  { %s516_s30 = scalar_lea.hbm %s707_s0, 128 }
  0x18   :  { %p517_p8 = scmp.ne.s32.totalorder %s707_s0, %s516_s30  ;;  %p520_p9 = scmp.lt.u32.totalorder %s516_s30, %s707_s0 }
  0x1a   :  { %p522_p10 = pnand %p520_p9, %p517_p8 }
  0x1c   :  { %525 = shalt.err (!%p522_p10)
}
  0x1d   :  { %s526_s3 = scalar_lea.vmem %s25_s25, 128  ;;  %p531_p12 = scmp.lt.s32.totalorder %s25_s25, %s25_s25 }
  0x1e   :  { %p527_p11 = scmp.ne.s32.totalorder %s25_s25, %s526_s3  ;;  %p532_p13 = scmp.lt.s32.totalorder %s526_s3, %s526_s3 }
  0x20   :  { %p533_p0 = por %p532_p13, %p531_p12 }
  0x22   :  { %p534_p1 = pnand %p533_p0, %p527_p11 }
  0x24   :  { %537 = shalt.err (!%p534_p1)
}
  0x25   :  { %27 = dma.hbm_to_vmem [thread:$0]  %s707_s0, 128, %s25_s25, [#allocation4]  }
  0x26   :  { %s538_s18 = scalar_lea.hbm %s712_s5, 1024 }
  0x27   :  { %p539_p2 = scmp.ne.s32.totalorder %s712_s5, %s538_s18  ;;  %p542_p3 = scmp.lt.u32.totalorder %s538_s18, %s712_s5 }
  0x29   :  { %p544_p4 = pnand %p542_p3, %p539_p2 }
  0x2b   :  { %547 = shalt.err (!%p544_p4)
}
  0x2c   :  { %s548_s24 = scalar_lea.vmem %s52_s27, 1024  ;;  %p553_p6 = scmp.lt.s32.totalorder %s52_s27, %s52_s27 }
  0x2d   :  { %p549_p5 = scmp.ne.s32.totalorder %s52_s27, %s548_s24  ;;  %p554_p7 = scmp.lt.s32.totalorder %s548_s24, %s548_s24 }
  0x2f   :  { %p555_p8 = por %p554_p7, %p553_p6 }
  0x31   :  { %p556_p9 = pnand %p555_p8, %p549_p5 }
  0x33   :  { %559 = shalt.err (!%p556_p9)
}
  0x34   :  { %57 = dma.hbm_to_vmem [thread:$0]  %s712_s5, 1024, %s52_s27, [#allocation6], %s565_s20, %s565_s20, %s566_s21  }
  0x35   :  { %560 = dma.done.wait [#allocation4], 128  }
  0x36   :  { %561 = vsyncadd [#allocation4], 4294967168 }
  0x37   :  { %562 = dma.done.wait [#allocation6], 2048  }
  0x38   :  { %563 = vsyncadd [#allocation6], 4294965248  ;;  %v569_v1 = vmov 0.0   ;;  %vm570_vm0 = vmmov 0   ;;  %vm88_vm1 = vcmask 1043456   ;;  %v74_v3 = vld [vmem:[#allocation3] sm:$0xff]  ;;  %v361_v38 = vlaneseq }
  0x39   :  { %425 = vmatprep.subr.bf16.mxu0 %v569_v1  ;;  %427 = vmatprep.mubr.msk.bf16.mxu0 %vm570_vm0, %v569_v1  ;;  %v76_v2 = vld [vmem:[%s708_s1] sm:$0xf]  ;;  %v75_v5 = vpack.c.bf16 %v74_v3, %v74_v3  ;;  %v478_v6 = vld [vmem:[#allocation5] sm:$0xff]   ;;  %vm84_vm2 = vcmask 64512   ;;  %v479_v7 = vld [vmem:[#allocation5 + $0x8] sm:$0xff]   ;;  %vm376_vm3 = vcmask 7168  }
  0x3a   :  { %431 = vmatprep.subr.bf16.mxu1 %v569_v1  ;;  %447 = vmatprep.mubr.msk.bf16.mxu1 %vm570_vm0, %v569_v1  ;;  %v90_v4 = vsel %vm88_vm1, %v76_v2, 0  ;;  %v480_v8 = vld [vmem:[#allocation5 + $0x10] sm:$0xff]   ;;  %v481_v9 = vld [vmem:[#allocation5 + $0x18] sm:$0xff]   ;;  %v482_v10 = vld [vmem:[#allocation5 + $0x20] sm:$0xff]   ;;  %v362_v39 = vshrl.u32 %v361_v38, 7 }
  0x3b   :  { %426 = vmatpush3.bf16.msra.mxu0 %v90_v4  ;;  %432 = vmatpush3.bf16.msra.mxu1 %v478_v6  ;;  %v483_v11 = vld [vmem:[#allocation5 + $0x28] sm:$0xff]   ;;  %v484_v12 = vld [vmem:[#allocation5 + $0x30] sm:$0xff]   ;;  %v485_v13 = vld [vmem:[#allocation5 + $0x38] sm:$0xff]  }
  0x3c   :  { %451 = vmatprep.subr.bf16.mxu0 %v569_v1  ;;  %433 = vmatprep.subr.bf16.mxu1 %v569_v1  ;;  %v486_v14 = vld [vmem:[#allocation7] sm:$0xff]   ;;  %v487_v15 = vld [vmem:[#allocation7 + $0x8] sm:$0xff]   ;;  %v488_v16 = vld [vmem:[#allocation7 + $0x10] sm:$0xff]   ;;  %v363_v42 = vsub.s32 0, %v362_v39 }
  0x3d   :  { %v489_v17 = vld [vmem:[#allocation7 + $0x18] sm:$0xff]   ;;  %v490_v18 = vld [vmem:[#allocation7 + $0x20] sm:$0xff]   ;;  %v491_v19 = vld [vmem:[#allocation7 + $0x28] sm:$0xff]  }
  0x3e   :  { %428 = vmatmul.mubr.msk.bf16.vlgmr.msra.gmra.mrb[0].mxu0 %vm84_vm2, %v75_v5  ;;  %v384_v20 = vld [vmem:[%s709_s2] ss:$0 sm:$0xff]  ;;  %v493_v29 = vld [vmem:[#allocation7 + $0x38] sm:$0xff]  }
  0x3f   :  { %467 = vmatprep.mubr.msk.bf16.mxu0 %vm570_vm0, %v569_v1  ;;  %434 = vmatpush3.bf16.msra.mxu1 %v479_v7  ;;  %v492_v28 = vld [vmem:[#allocation7 + $0x30] sm:$0xff]  }
  0x40   :  { %435 = vmatprep.subr.bf16.mxu1 %v569_v1  ;;  %452 = vmatpush3.bf16.msra.mxu0 %v486_v14  ;;  %v386_v30 = vld [vmem:[%s711_s4] ss:$0 sm:$0xff] }
  0x41   :  { %453 = vmatprep.subr.bf16.mxu0 %v569_v1  ;;  %v359_v40 = vld [vmem:[%s714_s7] sm:$0x1] }
  0x42   :  { %v360_v41 = vunpack.c.l.bf16 %v359_v40  ;;  %v395_v43 = vld [vmem:[%s713_s6] ss:$0 sm:$0xff] }
  0x43   :  { %436 = vmatpush3.bf16.msra.mxu1 %v480_v8  ;;  %v404_v52 = vld [vmem:[#allocation2] ss:$0 sm:$0xff] }
  0x44   :  { %437 = vmatprep.subr.bf16.mxu1 %v569_v1  ;;  %454 = vmatpush3.bf16.msra.mxu0 %v487_v15  ;;  %v364_v47 = vrot.slane %v360_v41, %v363_v42 }
  0x45   :  { %455 = vmatprep.subr.bf16.mxu0 %v569_v1 }
  0x47   :  { %438 = vmatpush3.bf16.msra.mxu1 %v481_v9 }
  0x48   :  { %439 = vmatprep.subr.bf16.mxu1 %v569_v1  ;;  %456 = vmatpush3.bf16.msra.mxu0 %v488_v16 }
  0x49   :  { %457 = vmatprep.subr.bf16.mxu0 %v569_v1 }
  0x4b   :  { %440 = vmatpush3.bf16.msra.mxu1 %v482_v10 }
  0x4c   :  { %441 = vmatprep.subr.bf16.mxu1 %v569_v1  ;;  %458 = vmatpush3.bf16.msra.mxu0 %v489_v17 }
  0x4d   :  { %459 = vmatprep.subr.bf16.mxu0 %v569_v1 }
  0x4f   :  { %442 = vmatpush3.bf16.msra.mxu1 %v483_v11 }
  0x50   :  { %443 = vmatprep.subr.bf16.mxu1 %v569_v1  ;;  %460 = vmatpush3.bf16.msra.mxu0 %v490_v18 }
  0x51   :  { %461 = vmatprep.subr.bf16.mxu0 %v569_v1 }
  0x53   :  { %444 = vmatpush3.bf16.msra.mxu1 %v484_v12 }
  0x54   :  { %445 = vmatprep.subr.bf16.mxu1 %v569_v1  ;;  %462 = vmatpush3.bf16.msra.mxu0 %v491_v19 }
  0x55   :  { %463 = vmatprep.subr.bf16.mxu0 %v569_v1 }
  0x57   :  { %446 = vmatpush3.bf16.msra.mxu1 %v485_v13 }
  0x58   :  { %464 = vmatpush3.bf16.msra.mxu0 %v492_v28 }
  0x59   :  { %465 = vmatprep.subr.bf16.mxu0 %v569_v1 }
  0x5c   :  { %466 = vmatpush3.bf16.msra.mxu0 %v493_v29 }
 0x111   :  { %v126_v21 = vpop.f32.mrb[0].mxu0 }
 0x112   :  { %v127_v22 = vadd.f32 %v384_v20, %v126_v21  ;;  %v429_v23 = vpop.f32.mrb[1].mxu0 }
 0x113   :  { %v129_v24 = vpop.f32.mrb[2].mxu0 }
 0x114   :  { %v132_v25 = vmax.f32 %v127_v22, 0.0  ;;  %v430_v26 = vpop.f32.mrb[3].mxu0 }
 0x116   :  { %v133_v27 = vpack.c.bf16 %v132_v25, %v132_v25 }
 0x118   :  { %448 = vmatmul.mubr.bf16.vlgmr.msra.gmra.mrb[0].mxu1 %v133_v27 }
 0x1eb   :  { %v239_v31 = vpop.f32.mrb[0].mxu1 }
 0x1ec   :  { %v240_v32 = vadd.f32 %v386_v30, %v239_v31  ;;  %v449_v33 = vpop.f32.mrb[1].mxu1 }
 0x1ed   :  { %v242_v34 = vpop.f32.mrb[2].mxu1 }
 0x1ee   :  { %v245_v35 = vmax.f32 %v240_v32, 0.0  ;;  %v450_v36 = vpop.f32.mrb[3].mxu1 }
 0x1f0   :  { %v246_v37 = vpack.c.bf16 %v245_v35, %v245_v35 }
 0x1f2   :  { %468 = vmatmul.mubr.bf16.vlgmr.msra.gmra.mrb[4].mxu0 %v246_v37 }
 0x2c5   :  { %v352_v44 = vpop.f32.mrb[4].mxu0 }
 0x2c6   :  { %v353_v45 = vadd.f32 %v395_v43, %v352_v44  ;;  %v469_v46 = vpop.f32.mrb[5].mxu0 }
 0x2c7   :  { %v355_v48 = vpop.f32.mrb[6].mxu0 }
 0x2c8   :  { %v358_v49 = vmax.f32 %v353_v45, 0.0  ;;  %v470_v50 = vpop.f32.mrb[7].mxu0 }
 0x2ca   :  { %v365_v51 = vmul.f32 %v364_v47, %v358_v49 }
 0x2cc   :  { %366 = vadd.xlane.f32.xlu0 %v365_v51 }
 0x359   :  { %v367_v53 = vpop.xlane.xlu0 %366 }
 0x35a   :  { %v375_v54 = vadd.f32 %v404_v52, %v367_v53 }
 0x35c   :  { %377 = vst.msk [vmem:[%s716_s9] sm:$0xff] %vm376_vm3, %v375_v54 }
 0x35d   :  { %382 = vsyncpa [#allocation4], 1 }
 0x35e   :  { %383 = vsyncpa [#allocation6], 1 }

</bundles_post_ra>
